<compile_context>
chip_gen: v7x
topology: tpu7x:2x2x1
jax: 0.10.0
libtpu: 0.0.40
codegen_flags: <defaults>
</compile_context>

<pallas_src>
import jax
import jax.numpy as jnp
from jax import lax
from jax.experimental import pallas as pl
from jax.experimental.pallas import tpu as pltpu


def nonlinear_typebin_kernel(inp_ref, type_ref, wh_ref, bh_ref, wo_ref, bo_ref, out_ref):
    tb = inp_ref.shape[0]
    in_nc = inp_ref.shape[1]
    nc = wh_ref.shape[1]
    D = wo_ref.shape[1]
    K = type_ref.shape[1]

    # ---- hidden Linear + LeakyReLU --------------------------------------------------
    if in_nc <= 16:
        # Tiny contraction dim: VPU broadcast-FMAs beat a heavily padded MXU matmul.
        inp = inp_ref[...]                                   # (tb, in_nc) f32
        x = bh_ref[...] + inp[:, 0:1] * wh_ref[0:1, :]       # (tb, nc)
        for c in range(1, in_nc):
            x = x + inp[:, c:c + 1] * wh_ref[c:c + 1, :]
    else:
        x = jnp.dot(
            inp_ref[...].astype(jnp.bfloat16), wh_ref[...],
            preferred_element_type=jnp.float32,
        ) + bh_ref[...]
    x = jnp.where(x >= 0, x, 0.01 * x)                       # nn.LeakyReLU() default slope

    # ---- output Linear (bf16 MXU, f32 accumulate) ------------------------------------
    y = jnp.dot(
        x.astype(jnp.bfloat16), wo_ref[...],
        preferred_element_type=jnp.float32,
    ) + bo_ref[...]                                          # (tb, D) f32

    # ---- out.gather(1, type_): output[b, k] = y[b, type_[b, k]] ----------------------
    # Mask-select on the VPU, D-reduction on the (otherwise idle) MXU via a ones column,
    # result streamed into a static column slice of the VMEM output block.
    out_ref[...] = jnp.zeros_like(out_ref)                   # zero lane padding (Kpad > K)
    idx = type_ref[...]                                      # (tb, K) int32
    d_iota = lax.broadcasted_iota(jnp.int32, (tb, D), 1)     # hoisted lane index along D
    ones_col = jnp.ones((D, 1), jnp.float32)                 # hoisted reduction vector
    for k in range(K):                                       # K is small & static
        mask = idx[:, k:k + 1] == d_iota                     # (tb, D)
        masked = jnp.where(mask, y, 0.0)                     # (tb, D) f32 (exact on v5e too)
        val = jnp.dot(masked, ones_col,
                      preferred_element_type=jnp.float32)    # (tb, 1) MXU reduce over D
        out_ref[:, k:k + 1] = val


def nonlinear_typebin(inp, type_, wh, bh, wo, bo, *, tb=None):
    """inp: (B, in_nc) f32; type_: (B, K) integer indices into the out_nc*num_bins axis.
    wh: (in_nc, nc), bh: (nc,) or (1, nc), wo: (nc, D), bo: (D,) or (1, D)
    (weights stored pre-transposed as (in_features, out_features))."""
    B, in_nc = inp.shape
    Bt, K = type_.shape
    assert Bt == B, "inp and type_ must share the batch dimension"
    nc = wh.shape[1]
    D = wo.shape[1]

    inp = inp.astype(jnp.float32)
    type_ = type_.astype(jnp.int32)

    # Lane-dense output width (multiple of 128); sliced back to K below.
    Kpad = ((K + 127) // 128) * 128

    # Batch tile: ~B/2 (so v7x's two TensorCores both get work once B >= 16), rounded to
    # a sublane multiple, capped at 128 rows to keep the gather working set in registers.
    if tb is None:
        half = (B + 1) // 2
        tb = min(128, max(8, ((half + 7) // 8) * 8))
    tb = max(8, (tb // 8) * 8)

    # Pad the batch to a tile multiple (no divisibility assert); padded rows are discarded.
    B_pad = ((B + tb - 1) // tb) * tb
    if B_pad != B:
        inp = jnp.pad(inp, ((0, B_pad - B), (0, 0)))
        type_ = jnp.pad(type_, ((0, B_pad - B), (0, 0)))
    grid = (B_pad // tb,)

    # Weight dtypes: bf16 for the big MXU matmul (half the DMA/VMEM); keep wh in f32 when
    # the kernel takes the VPU fast path for tiny in_nc. Biases stay f32.
    wh_in = wh.astype(jnp.float32) if in_nc <= 16 else wh.astype(jnp.bfloat16)
    wo_in = wo.astype(jnp.bfloat16)
    bh_in = bh.reshape(1, nc).astype(jnp.float32)
    bo_in = bo.reshape(1, D).astype(jnp.float32)

    out_padded = pl.pallas_call(
        nonlinear_typebin_kernel,
        out_shape=jax.ShapeDtypeStruct((B_pad, Kpad), jnp.float32),
        grid_spec=pltpu.PrefetchScalarGridSpec(
            num_scalar_prefetch=0,
            grid=grid,
            in_specs=[
                pl.BlockSpec((tb, in_nc), lambda i: (i, 0)),   # inp   : tiled on batch
                pl.BlockSpec((tb, K),     lambda i: (i, 0)),   # type_ : tiled on batch
                pl.BlockSpec((in_nc, nc), lambda i: (0, 0)),   # wh    : resident
                pl.BlockSpec((1, nc),     lambda i: (0, 0)),   # bh    : resident
                pl.BlockSpec((nc, D),     lambda i: (0, 0)),   # wo    : resident
                pl.BlockSpec((1, D),      lambda i: (0, 0)),   # bo    : resident
            ],
            out_specs=pl.BlockSpec((tb, Kpad), lambda i: (i, 0)),
        ),
        compiler_params=pltpu.CompilerParams(
            dimension_semantics=("parallel",),          # megacore / 2-TC batch sharding
            vmem_limit_bytes=32 * 1024 * 1024,          # fits v5e/v6e/v7x scoped VMEM
        ),
    )(inp, type_, wh_in, bh_in, wo_in, bo_in)

    return out_padded[:B, :K]


if __name__ == "__main__":
    # Small shapes consistent with the module (scaled-down nc / out_nc / num_bins).
    B, in_nc, nc, out_nc, num_bins = 8, 3, 256, 8, 16
    D = out_nc * num_bins          # 128
    K = out_nc                     # one bin index per output channel (typical gather use)

    key = jax.random.PRNGKey(0)
    k1, k2, k3, k4, k5, k6 = jax.random.split(key, 6)

    inp = jax.random.normal(k1, (B, in_nc), jnp.float32)

    # Deterministic synthetic parameters (PyTorch-Linear-style uniform init ranges),
    # stored pre-transposed as (in_features, out_features).
    bnd_h = 1.0 / (in_nc ** 0.5)
    bnd_o = 1.0 / (nc ** 0.5)
    wh = jax.random.uniform(k2, (in_nc, nc), jnp.float32, -bnd_h, bnd_h)
    bh = jax.random.uniform(k3, (1, nc), jnp.float32, -bnd_h, bnd_h)
    wo = jax.random.uniform(k4, (nc, D), jnp.float32, -bnd_o, bnd_o)
    bo = jax.random.uniform(k5, (1, D), jnp.float32, -bnd_o, bnd_o)

    # type_[b, j] = j * num_bins + bin_j  (indices into the D-wide output row).
    bins = jax.random.randint(k6, (B, K), 0, num_bins)
    type_ = (jnp.arange(K, dtype=jnp.int32)[None, :] * num_bins + bins).astype(jnp.int32)

    out = nonlinear_typebin(inp, type_, wh, bh, wo, bo)
    out = jax.block_until_ready(out)
    assert out.shape == (B, K)

    # Reference mirroring the kernel's dtype strategy (f32 hidden path for tiny in_nc,
    # bf16 operands / f32 accumulate for the output matmul, exact f32 gather).
    h = inp @ wh + bh
    h = jnp.where(h >= 0, h, 0.01 * h)
    y_bf = jnp.dot(h.astype(jnp.bfloat16), wo.astype(jnp.bfloat16),
                   preferred_element_type=jnp.float32) + bo
    ref_bf = jnp.take_along_axis(y_bf, type_, axis=1)
    assert jnp.allclose(out, ref_bf, atol=2e-2, rtol=2e-2), "mismatch vs bf16-mirrored reference"

    # Looser sanity check vs the pure-f32 PyTorch-equivalent math.
    y32 = h @ wo + bo
    ref32 = jnp.take_along_axis(y32, type_, axis=1)
    assert jnp.allclose(out, ref32, atol=5e-2, rtol=5e-2), "mismatch vs f32 reference"

    print("KERNEL_OK")
</pallas_src>

<mosaic_0001>
module attributes {stable_mosaic.version = 11 : i64} {
  func.func @nonlinear_typebin_kernel(%arg0: i32, %arg1: memref<8x3xf32, #tpu.memory_space<vmem>>, %arg2: memref<8x8xi32, #tpu.memory_space<vmem>>, %arg3: memref<3x256xf32, #tpu.memory_space<vmem>>, %arg4: memref<1x256xf32, #tpu.memory_space<vmem>>, %arg5: memref<256x128xbf16, #tpu.memory_space<vmem>>, %arg6: memref<1x128xf32, #tpu.memory_space<vmem>>, %arg7: memref<8x128xf32, #tpu.memory_space<vmem>>) attributes {dimension_semantics = [#tpu.dimension_semantics<parallel>], iteration_bounds = array<i64: 1>, scalar_prefetch = 0 : i64, scratch_operands = 0 : i64, tpu.core_type = #tpu.core_type<tc>, window_params = [{transform_indices = @transform_0, window_bounds = array<i64: 8, 3>}, {transform_indices = @transform_1, window_bounds = array<i64: 8, 8>}, {pipeline_mode = #tpu.pipeline_mode<synchronous>, transform_indices = @transform_2, window_bounds = array<i64: 3, 256>}, {pipeline_mode = #tpu.pipeline_mode<synchronous>, transform_indices = @transform_3, window_bounds = array<i64: 1, 256>}, {pipeline_mode = #tpu.pipeline_mode<synchronous>, transform_indices = @transform_4, window_bounds = array<i64: 256, 128>}, {pipeline_mode = #tpu.pipeline_mode<synchronous>, transform_indices = @transform_5, window_bounds = array<i64: 1, 128>}, {transform_indices = @transform_6, window_bounds = array<i64: 8, 128>}]} {
    %c0 = arith.constant 0 : index
    %c0_0 = arith.constant 0 : index
    %0 = vector.load %arg1[%c0, %c0_0] : memref<8x3xf32, #tpu.memory_space<vmem>>, vector<8x3xf32>
    %c0_1 = arith.constant 0 : index
    %c0_2 = arith.constant 0 : index
    %1 = vector.load %arg4[%c0_1, %c0_2] : memref<1x256xf32, #tpu.memory_space<vmem>>, vector<1x256xf32>
    %2 = vector.extract_strided_slice %0 {offsets = [0, 0], sizes = [8, 1], strides = [1, 1]} : vector<8x3xf32> to vector<8x1xf32>
    %c0_3 = arith.constant 0 : index
    %c0_4 = arith.constant 0 : index
    %3 = vector.load %arg3[%c0_3, %c0_4] : memref<3x256xf32, #tpu.memory_space<vmem>>, vector<1x256xf32>
    %4 = vector.broadcast %2 : vector<8x1xf32> to vector<8x256xf32>
    %5 = vector.broadcast %3 : vector<1x256xf32> to vector<8x256xf32>
    %6 = arith.mulf %4, %5 : vector<8x256xf32>
    %7 = vector.broadcast %1 : vector<1x256xf32> to vector<8x256xf32>
    %8 = arith.addf %7, %6 : vector<8x256xf32>
    %9 = vector.extract_strided_slice %0 {offsets = [0, 1], sizes = [8, 1], strides = [1, 1]} : vector<8x3xf32> to vector<8x1xf32>
    %c1 = arith.constant 1 : index
    %c0_5 = arith.constant 0 : index
    %10 = vector.load %arg3[%c1, %c0_5] : memref<3x256xf32, #tpu.memory_space<vmem>>, vector<1x256xf32>
    %11 = vector.broadcast %9 : vector<8x1xf32> to vector<8x256xf32>
    %12 = vector.broadcast %10 : vector<1x256xf32> to vector<8x256xf32>
    %13 = arith.mulf %11, %12 : vector<8x256xf32>
    %14 = arith.addf %8, %13 : vector<8x256xf32>
    %15 = vector.extract_strided_slice %0 {offsets = [0, 2], sizes = [8, 1], strides = [1, 1]} : vector<8x3xf32> to vector<8x1xf32>
    %c2 = arith.constant 2 : index
    %c0_6 = arith.constant 0 : index
    %16 = vector.load %arg3[%c2, %c0_6] : memref<3x256xf32, #tpu.memory_space<vmem>>, vector<1x256xf32>
    %17 = vector.broadcast %15 : vector<8x1xf32> to vector<8x256xf32>
    %18 = vector.broadcast %16 : vector<1x256xf32> to vector<8x256xf32>
    %19 = arith.mulf %17, %18 : vector<8x256xf32>
    %20 = arith.addf %14, %19 : vector<8x256xf32>
    %cst = arith.constant 0.000000e+00 : f32
    %21 = vector.broadcast %cst : f32 to vector<8x256xf32>
    %22 = arith.cmpf oge, %20, %21 : vector<8x256xf32>
    %cst_7 = arith.constant 0.00999999977 : f32
    %23 = vector.broadcast %cst_7 : f32 to vector<8x256xf32>
    %24 = arith.mulf %23, %20 : vector<8x256xf32>
    %25 = arith.select %22, %20, %24 : vector<8x256xi1>, vector<8x256xf32>
    %26 = arith.truncf %25 : vector<8x256xf32> to vector<8x256xbf16>
    %c0_8 = arith.constant 0 : index
    %c0_9 = arith.constant 0 : index
    %27 = vector.load %arg5[%c0_8, %c0_9] : memref<256x128xbf16, #tpu.memory_space<vmem>>, vector<256x128xbf16>
    %cst_10 = arith.constant dense<0.000000e+00> : vector<8x128xf32>
    %28 = tpu.matmul %26, %27, %cst_10 {dimension_numbers = #tpu.dot_dimension_numbers<[1], [0], [0], [1], [0, 0, 1, 1], [], []>} : vector<8x256xbf16>, vector<256x128xbf16>, vector<8x128xf32> -> vector<8x128xf32>
    %c0_11 = arith.constant 0 : index
    %c0_12 = arith.constant 0 : index
    %29 = vector.load %arg6[%c0_11, %c0_12] : memref<1x128xf32, #tpu.memory_space<vmem>>, vector<1x128xf32>
    %30 = vector.broadcast %29 : vector<1x128xf32> to vector<8x128xf32>
    %31 = arith.addf %28, %30 : vector<8x128xf32>
    %cst_13 = arith.constant 0.000000e+00 : f32
    %32 = vector.broadcast %cst_13 : f32 to vector<8x128xf32>
    %c0_14 = arith.constant 0 : index
    %c0_15 = arith.constant 0 : index
    %33 = vector.load %arg7[%c0_14, %c0_15] : memref<8x128xf32, #tpu.memory_space<vmem>>, vector<8x128xf32>
    tpu.vector_store %arg7[%c0_14, %c0_15], %32 {strides = array<i32>} : memref<8x128xf32, #tpu.memory_space<vmem>>, vector<8x128xf32>,
    %c0_16 = arith.constant 0 : index
    %c0_17 = arith.constant 0 : index
    %34 = vector.load %arg2[%c0_16, %c0_17] : memref<8x8xi32, #tpu.memory_space<vmem>>, vector<8x8xi32>
    %35 = tpu.iota {dimensions = array<i32: 1>} : vector<8x128xi32>
    %cst_18 = arith.constant 1.000000e+00 : f32
    %36 = vector.broadcast %cst_18 : f32 to vector<128x1xf32>
    %37 = vector.extract_strided_slice %34 {offsets = [0, 0], sizes = [8, 1], strides = [1, 1]} : vector<8x8xi32> to vector<8x1xi32>
    %38 = vector.broadcast %37 : vector<8x1xi32> to vector<8x128xi32>
    %39 = arith.cmpi eq, %38, %35 : vector<8x128xi32>
    %cst_19 = arith.constant 0.000000e+00 : f32
    %40 = vector.broadcast %cst_19 : f32 to vector<8x128xf32>
    %41 = arith.select %39, %31, %40 : vector<8x128xi1>, vector<8x128xf32>
    %cst_20 = arith.constant dense<0.000000e+00> : vector<8x1xf32>
    %42 = tpu.matmul %41, %36, %cst_20 {dimension_numbers = #tpu.dot_dimension_numbers<[1], [0], [0], [1], [0, 0, 1, 1], [], []>} : vector<8x128xf32>, vector<128x1xf32>, vector<8x1xf32> -> vector<8x1xf32>
    %c0_21 = arith.constant 0 : index
    %c0_22 = arith.constant 0 : index
    %43 = vector.load %arg7[%c0_21, %c0_22] : memref<8x128xf32, #tpu.memory_space<vmem>>, vector<8x1xf32>
    tpu.vector_store %arg7[%c0_21, %c0_22], %42 {strides = array<i32>} : memref<8x128xf32, #tpu.memory_space<vmem>>, vector<8x1xf32>,
    %44 = vector.extract_strided_slice %34 {offsets = [0, 1], sizes = [8, 1], strides = [1, 1]} : vector<8x8xi32> to vector<8x1xi32>
    %45 = vector.broadcast %44 : vector<8x1xi32> to vector<8x128xi32>
    %46 = arith.cmpi eq, %45, %35 : vector<8x128xi32>
    %cst_23 = arith.constant 0.000000e+00 : f32
    %47 = vector.broadcast %cst_23 : f32 to vector<8x128xf32>
    %48 = arith.select %46, %31, %47 : vector<8x128xi1>, vector<8x128xf32>
    %cst_24 = arith.constant dense<0.000000e+00> : vector<8x1xf32>
    %49 = tpu.matmul %48, %36, %cst_24 {dimension_numbers = #tpu.dot_dimension_numbers<[1], [0], [0], [1], [0, 0, 1, 1], [], []>} : vector<8x128xf32>, vector<128x1xf32>, vector<8x1xf32> -> vector<8x1xf32>
    %c0_25 = arith.constant 0 : index
    %c1_26 = arith.constant 1 : index
    %50 = vector.load %arg7[%c0_25, %c1_26] : memref<8x128xf32, #tpu.memory_space<vmem>>, vector<8x1xf32>
    tpu.vector_store %arg7[%c0_25, %c1_26], %49 {strides = array<i32>} : memref<8x128xf32, #tpu.memory_space<vmem>>, vector<8x1xf32>,
    %51 = vector.extract_strided_slice %34 {offsets = [0, 2], sizes = [8, 1], strides = [1, 1]} : vector<8x8xi32> to vector<8x1xi32>
    %52 = vector.broadcast %51 : vector<8x1xi32> to vector<8x128xi32>
    %53 = arith.cmpi eq, %52, %35 : vector<8x128xi32>
    %cst_27 = arith.constant 0.000000e+00 : f32
    %54 = vector.broadcast %cst_27 : f32 to vector<8x128xf32>
    %55 = arith.select %53, %31, %54 : vector<8x128xi1>, vector<8x128xf32>
    %cst_28 = arith.constant dense<0.000000e+00> : vector<8x1xf32>
    %56 = tpu.matmul %55, %36, %cst_28 {dimension_numbers = #tpu.dot_dimension_numbers<[1], [0], [0], [1], [0, 0, 1, 1], [], []>} : vector<8x128xf32>, vector<128x1xf32>, vector<8x1xf32> -> vector<8x1xf32>
    %c0_29 = arith.constant 0 : index
    %c2_30 = arith.constant 2 : index
    %57 = vector.load %arg7[%c0_29, %c2_30] : memref<8x128xf32, #tpu.memory_space<vmem>>, vector<8x1xf32>
    tpu.vector_store %arg7[%c0_29, %c2_30], %56 {strides = array<i32>} : memref<8x128xf32, #tpu.memory_space<vmem>>, vector<8x1xf32>,
    %58 = vector.extract_strided_slice %34 {offsets = [0, 3], sizes = [8, 1], strides = [1, 1]} : vector<8x8xi32> to vector<8x1xi32>
    %59 = vector.broadcast %58 : vector<8x1xi32> to vector<8x128xi32>
    %60 = arith.cmpi eq, %59, %35 : vector<8x128xi32>
    %cst_31 = arith.constant 0.000000e+00 : f32
    %61 = vector.broadcast %cst_31 : f32 to vector<8x128xf32>
    %62 = arith.select %60, %31, %61 : vector<8x128xi1>, vector<8x128xf32>
    %cst_32 = arith.constant dense<0.000000e+00> : vector<8x1xf32>
    %63 = tpu.matmul %62, %36, %cst_32 {dimension_numbers = #tpu.dot_dimension_numbers<[1], [0], [0], [1], [0, 0, 1, 1], [], []>} : vector<8x128xf32>, vector<128x1xf32>, vector<8x1xf32> -> vector<8x1xf32>
    %c0_33 = arith.constant 0 : index
    %c3 = arith.constant 3 : index
    %64 = vector.load %arg7[%c0_33, %c3] : memref<8x128xf32, #tpu.memory_space<vmem>>, vector<8x1xf32>
    tpu.vector_store %arg7[%c0_33, %c3], %63 {strides = array<i32>} : memref<8x128xf32, #tpu.memory_space<vmem>>, vector<8x1xf32>,
    %65 = vector.extract_strided_slice %34 {offsets = [0, 4], sizes = [8, 1], strides = [1, 1]} : vector<8x8xi32> to vector<8x1xi32>
    %66 = vector.broadcast %65 : vector<8x1xi32> to vector<8x128xi32>
    %67 = arith.cmpi eq, %66, %35 : vector<8x128xi32>
    %cst_34 = arith.constant 0.000000e+00 : f32
    %68 = vector.broadcast %cst_34 : f32 to vector<8x128xf32>
    %69 = arith.select %67, %31, %68 : vector<8x128xi1>, vector<8x128xf32>
    %cst_35 = arith.constant dense<0.000000e+00> : vector<8x1xf32>
    %70 = tpu.matmul %69, %36, %cst_35 {dimension_numbers = #tpu.dot_dimension_numbers<[1], [0], [0], [1], [0, 0, 1, 1], [], []>} : vector<8x128xf32>, vector<128x1xf32>, vector<8x1xf32> -> vector<8x1xf32>
    %c0_36 = arith.constant 0 : index
    %c4 = arith.constant 4 : index
    %71 = vector.load %arg7[%c0_36, %c4] : memref<8x128xf32, #tpu.memory_space<vmem>>, vector<8x1xf32>
    tpu.vector_store %arg7[%c0_36, %c4], %70 {strides = array<i32>} : memref<8x128xf32, #tpu.memory_space<vmem>>, vector<8x1xf32>,
    %72 = vector.extract_strided_slice %34 {offsets = [0, 5], sizes = [8, 1], strides = [1, 1]} : vector<8x8xi32> to vector<8x1xi32>
    %73 = vector.broadcast %72 : vector<8x1xi32> to vector<8x128xi32>
    %74 = arith.cmpi eq, %73, %35 : vector<8x128xi32>
    %cst_37 = arith.constant 0.000000e+00 : f32
    %75 = vector.broadcast %cst_37 : f32 to vector<8x128xf32>
    %76 = arith.select %74, %31, %75 : vector<8x128xi1>, vector<8x128xf32>
    %cst_38 = arith.constant dense<0.000000e+00> : vector<8x1xf32>
    %77 = tpu.matmul %76, %36, %cst_38 {dimension_numbers = #tpu.dot_dimension_numbers<[1], [0], [0], [1], [0, 0, 1, 1], [], []>} : vector<8x128xf32>, vector<128x1xf32>, vector<8x1xf32> -> vector<8x1xf32>
    %c0_39 = arith.constant 0 : index
    %c5 = arith.constant 5 : index
    %78 = vector.load %arg7[%c0_39, %c5] : memref<8x128xf32, #tpu.memory_space<vmem>>, vector<8x1xf32>
    tpu.vector_store %arg7[%c0_39, %c5], %77 {strides = array<i32>} : memref<8x128xf32, #tpu.memory_space<vmem>>, vector<8x1xf32>,
    %79 = vector.extract_strided_slice %34 {offsets = [0, 6], sizes = [8, 1], strides = [1, 1]} : vector<8x8xi32> to vector<8x1xi32>
    %80 = vector.broadcast %79 : vector<8x1xi32> to vector<8x128xi32>
    %81 = arith.cmpi eq, %80, %35 : vector<8x128xi32>
    %cst_40 = arith.constant 0.000000e+00 : f32
    %82 = vector.broadcast %cst_40 : f32 to vector<8x128xf32>
    %83 = arith.select %81, %31, %82 : vector<8x128xi1>, vector<8x128xf32>
    %cst_41 = arith.constant dense<0.000000e+00> : vector<8x1xf32>
    %84 = tpu.matmul %83, %36, %cst_41 {dimension_numbers = #tpu.dot_dimension_numbers<[1], [0], [0], [1], [0, 0, 1, 1], [], []>} : vector<8x128xf32>, vector<128x1xf32>, vector<8x1xf32> -> vector<8x1xf32>
    %c0_42 = arith.constant 0 : index
    %c6 = arith.constant 6 : index
    %85 = vector.load %arg7[%c0_42, %c6] : memref<8x128xf32, #tpu.memory_space<vmem>>, vector<8x1xf32>
    tpu.vector_store %arg7[%c0_42, %c6], %84 {strides = array<i32>} : memref<8x128xf32, #tpu.memory_space<vmem>>, vector<8x1xf32>,
    %86 = vector.extract_strided_slice %34 {offsets = [0, 7], sizes = [8, 1], strides = [1, 1]} : vector<8x8xi32> to vector<8x1xi32>
    %87 = vector.broadcast %86 : vector<8x1xi32> to vector<8x128xi32>
    %88 = arith.cmpi eq, %87, %35 : vector<8x128xi32>
    %cst_43 = arith.constant 0.000000e+00 : f32
    %89 = vector.broadcast %cst_43 : f32 to vector<8x128xf32>
    %90 = arith.select %88, %31, %89 : vector<8x128xi1>, vector<8x128xf32>
    %cst_44 = arith.constant dense<0.000000e+00> : vector<8x1xf32>
    %91 = tpu.matmul %90, %36, %cst_44 {dimension_numbers = #tpu.dot_dimension_numbers<[1], [0], [0], [1], [0, 0, 1, 1], [], []>} : vector<8x128xf32>, vector<128x1xf32>, vector<8x1xf32> -> vector<8x1xf32>
    %c0_45 = arith.constant 0 : index
    %c7 = arith.constant 7 : index
    %92 = vector.load %arg7[%c0_45, %c7] : memref<8x128xf32, #tpu.memory_space<vmem>>, vector<8x1xf32>
    tpu.vector_store %arg7[%c0_45, %c7], %91 {strides = array<i32>} : memref<8x128xf32, #tpu.memory_space<vmem>>, vector<8x1xf32>,
    return
  }
  func.func @transform_0(%arg0: i32) -> (i32, i32) {
    %c0_i32 = arith.constant 0 : i32
    %c0_i32_0 = arith.constant 0 : i32
    return %arg0, %c0_i32 : i32, i32
  }
  func.func @transform_1(%arg0: i32) -> (i32, i32) {
    %c0_i32 = arith.constant 0 : i32
    %c0_i32_0 = arith.constant 0 : i32
    return %arg0, %c0_i32 : i32, i32
  }
  func.func @transform_2(%arg0: i32) -> (i32, i32) {
    %c0_i32 = arith.constant 0 : i32
    %c0_i32_0 = arith.constant 0 : i32
    %c0_i32_1 = arith.constant 0 : i32
    return %c0_i32, %c0_i32_0 : i32, i32
  }
  func.func @transform_3(%arg0: i32) -> (i32, i32) {
    %c0_i32 = arith.constant 0 : i32
    %c0_i32_0 = arith.constant 0 : i32
    %c0_i32_1 = arith.constant 0 : i32
    return %c0_i32, %c0_i32_0 : i32, i32
  }
  func.func @transform_4(%arg0: i32) -> (i32, i32) {
    %c0_i32 = arith.constant 0 : i32
    %c0_i32_0 = arith.constant 0 : i32
    %c0_i32_1 = arith.constant 0 : i32
    return %c0_i32, %c0_i32_0 : i32, i32
  }
  func.func @transform_5(%arg0: i32) -> (i32, i32) {
    %c0_i32 = arith.constant 0 : i32
    %c0_i32_0 = arith.constant 0 : i32
    %c0_i32_1 = arith.constant 0 : i32
    return %c0_i32, %c0_i32_0 : i32, i32
  }
  func.func @transform_6(%arg0: i32) -> (i32, i32) {
    %c0_i32 = arith.constant 0 : i32
    %c0_i32_0 = arith.constant 0 : i32
    return %arg0, %c0_i32 : i32, i32
  }
}

</mosaic_0001>

<bundles_post_ra>
// kernel: tpu_custom_call.1
= control target key start
LH: loop header
LB: loop body
LE: loop exit
PB: predicated region body
PF: predicated region fallthrough
CT: control target
= control target key end

     0   :  { %11 = vsyncpa [#allocation3], 0  ;;  %s1923_s0 = inlined_call_operand.vmem [shape: f32[8,3], index: 0, kind: input, shape index: {}]   ;;  %s1924_s1 = inlined_call_operand.vmem [shape: s32[8,8], index: 1, kind: input, shape index: {}]   ;;  %s1925_s2 = inlined_call_operand.vmem [shape: f32[3,256], index: 2, kind: input, shape index: {}]   ;;  %s1926_s3 = inlined_call_operand.vmem [shape: f32[1,256], index: 3, kind: input, shape index: {}]   ;;  %s1927_s4 = inlined_call_operand.hbm [shape: bf16[256,128], index: 4, kind: input, shape index: {}]   ;;  %s1928_s5 = inlined_call_operand.vmem [shape: f32[1,128], index: 5, kind: input, shape index: {}]   ;;  %s1929_s6 = inlined_call_operand.hbm [shape: f32[8,128], index: 6, kind: output, shape index: {}]  }
   0x1   :  { %12 = vsyncpa [#allocation4], 0  ;;  %s1652_s21 = smov [#allocation2]   ;;  %s1604_s25 = scalar_lea.hbm %s1927_s4, 2048 }
   0x2   :  { %s26_s22 = sshll.u32 %s1652_s21, 4  ;;  %p1605_p0 = scmp.ne.s32.totalorder %s1927_s4, %s1604_s25  ;;  %s27_s22 = int_to_ptr.vmem [resolvable:$true] %s26_s22 }
   0x3   :  { %p1608_p1 = scmp.lt.u32.totalorder %s1604_s25, %s1927_s4 }
   0x5   :  { %p1610_p2 = pnand %p1608_p1, %p1605_p0 }
   0x7   :  { %1613 = shalt.err (!%p1610_p2)
}
   0x8   :  { %s1614_s30 = scalar_lea.vmem %s27_s22, 2048  ;;  %p1619_p4 = scmp.lt.s32.totalorder %s27_s22, %s27_s22 }
   0x9   :  { %p1615_p3 = scmp.ne.s32.totalorder %s27_s22, %s1614_s30  ;;  %p1620_p5 = scmp.lt.s32.totalorder %s1614_s30, %s1614_s30 }
   0xb   :  { %p1621_p6 = por %p1620_p5, %p1619_p4 }
   0xd   :  { %p1622_p7 = pnand %p1621_p6, %p1615_p3 }
   0xf   :  { %1625 = shalt.err (!%p1622_p7)
}
  0x10   :  { %s1653_s7 = smov 64   ;;  %s1654_s8 = smov 4  }
  0x11   :  { %32 = dma.hbm_to_vmem [thread:$0]  %s1927_s4, 2048, %s27_s22, [#allocation3], %s1653_s7, %s1653_s7, %s1654_s8  }
  0x12   :  { %1648 = dma.done.wait [#allocation3], 2048  }
  0x13   :  { %1649 = vsyncadd [#allocation3], 4294965248  ;;  %v1655_v0 = vmov 0   ;;  %v1656_v1 = vmov 2   ;;  %v39_v2 = vld [vmem:[%s1923_s0] sm:$0xff]  ;;  %v1588_v3 = vld [vmem:[#allocation2 + $0x40] sm:$0xff]   ;;  %v48_v28 = vlaneseq }
  0x14   :  { %1576 = vset.pattern.permute.xlu0 %v1655_v0  ;;  %1578 = vset.pattern.permute.xlu1 %v1656_v1  ;;  %v1589_v4 = vld [vmem:[#allocation2] sm:$0xff]   ;;  %v1590_v5 = vld [vmem:[#allocation2 + $0x48] sm:$0xff]   ;;  %v1657_v7 = vmov 1   ;;  %v1592_v8 = vld [vmem:[#allocation2 + $0x50] sm:$0xff]   ;;  %v1658_v17 = vmov 0.0|0.0   ;;  %v1660_v20 = vmov 5  }
  0x15   :  { %44 = vperm.xlu0 %1576, %v39_v2   ;;  %97 = vperm.xlu1 %1578, %v39_v2   ;;  %v1591_v6 = vld [vmem:[#allocation2 + $0x8] sm:$0xff]   ;;  %v1593_v9 = vld [vmem:[#allocation2 + $0x10] sm:$0xff]   ;;  %v1594_v10 = vld [vmem:[#allocation2 + $0x58] sm:$0xff]   ;;  %v1659_v19 = vmov 1.0|1.0   ;;  %v1661_v24 = vmov 3  }
  0x16   :  { %988 = vmatprep.subr.bf16.mxu0 %v1588_v3  ;;  %v1595_v11 = vld [vmem:[#allocation2 + $0x18] sm:$0xff]   ;;  %v1596_v12 = vld [vmem:[#allocation2 + $0x60] sm:$0xff]   ;;  %v1598_v14 = vld [vmem:[#allocation2 + $0x68] sm:$0xff]   ;;  %1426 = vmatprep.subr.bf16.mxu1 %v1658_v17  ;;  %v1662_v25 = vmov 7   ;;  %v1663_v26 = vmov 4   ;;  %v1664_v27 = vmov 6  }
  0x17   :  { %989 = vmatpush3.bf16.msra.mxu0 %v1589_v4  ;;  %v1597_v13 = vld [vmem:[#allocation2 + $0x20] sm:$0xff]   ;;  %v299_v15 = vld [vmem:[%s1924_s1] sm:$0xff]  ;;  %v1599_v16 = vld [vmem:[#allocation2 + $0x28] sm:$0xff]   ;;  %1427 = vmatpush3.bf16.msra.mxu1 %v1659_v19  ;;  %v49_v29 = vshrl.u32 %v48_v28, 7  ;;  %vm1665_vm2 = vmmov 0   ;;  %vm377_vm11 = vcmask 7168  }
  0x18   :  { %990 = vmatprep.subr.bf16.mxu0 %v1590_v5  ;;  %v1600_v18 = vld [vmem:[#allocation2 + $0x70] sm:$0xff]   ;;  %1428 = vmatprep.subr.bf16.mxu1 %v1658_v17  ;;  %v1602_v22 = vld [vmem:[#allocation2 + $0x78] sm:$0xff]   ;;  %v1781_v5 = vand.u32 127, %v48_v28  ;;  %s1668_s20 = smov 3   ;;  %s1669_s21 = smov 2   ;;  %vm458_vm12 = vcmask 15368  }
  0x19   :  { %1577 = vset.pattern.permute.xlu0 %v1657_v7  ;;  %1579 = vset.pattern.permute.xlu1 %v1655_v0  ;;  %v1601_v21 = vld [vmem:[#allocation2 + $0x30] sm:$0xff]   ;;  %v1603_v23 = vld [vmem:[#allocation2 + $0x38] sm:$0xff]   ;;  %v50_v30 = vsub.s32 0, %v49_v29  ;;  %v54_v31 = vsub.s32 1, %v49_v29  ;;  %s1670_s22 = smov 5   ;;  %s1671_s23 = smov 6  }
  0x1a   :  { %76 = vperm.xlu0 %1577, %v39_v2   ;;  %303 = vperm.xlu1 %1579, %v299_v15   ;;  %v41_v32 = vld [vmem:[%s1925_s2] ss:$4 sm:$0x3]  ;;  %v962_v36 = vld [vmem:[%s1925_s2 + $0x2] ss:$4 sm:$0x3] }
  0x1b   :  { %991 = vmatpush3.bf16.msra.mxu0 %v1591_v6  ;;  %1429 = vmatpush3.bf16.msra.mxu1 %v1659_v19  ;;  %v40_v33 = vld [vmem:[%s1926_s3] sm:$0x3]  ;;  %v51_v34 = vrot.slane %v41_v32, %v50_v30  ;;  %v55_v35 = vrot.slane %v41_v32, %v54_v31  ;;  %v104_v41 = vrot.slane %v962_v36, %v50_v30  ;;  %s1672_s24 = smov 7   ;;  %vm539_vm13 = vcmask 23568   ;;  %s1673_s25 = smov [#allocation5]  }
  0x1c   :  { %992 = vmatprep.subr.bf16.mxu0 %v1592_v8  ;;  %1430 = vmatprep.subr.bf16.mxu1 %v1658_v17  ;;  %v961_v37 = vld [vmem:[%s1925_s2 + $0x1] ss:$4 sm:$0x3]  ;;  %v64_v39 = vrot.slane %v40_v33, %v50_v30  ;;  %v68_v40 = vrot.slane %v40_v33, %v54_v31  ;;  %v108_v42 = vrot.slane %v962_v36, %v54_v31  ;;  %v963_v6 = vld [vmem:[%s1928_s5] ss:$0 sm:$0xff]  ;;  %s1667_s5 = smov 1  }
  0x1d   :  { %v83_v45 = vrot.slane %v961_v37, %v50_v30  ;;  %v87_v46 = vrot.slane %v961_v37, %v54_v31  ;;  %vm620_vm14 = vcmask 31768   ;;  %vm701_vm15 = vcmask 39968   ;;  %s952_s26 = sshll.u32 %s1673_s25, 4  ;;  %s953_s26 = int_to_ptr.vmem [resolvable:$true] %s952_s26 }
  0x1e   :  { %1581 = vset.pattern.permute.xlu0 %v1656_v1  ;;  %1580 = vset.pattern.permute.xlu1 %v1657_v7  ;;  %v1666_v1 = vmov 0.0   ;;  %s1626_s27 = scalar_lea.vmem %s953_s26, 128  ;;  %p1631_p9 = scmp.lt.s32.totalorder %s953_s26, %s953_s26 }
  0x1f   :  { %993 = vmatpush3.bf16.msra.mxu0 %v1593_v9  ;;  %461 = vperm.xlu0 %1581, %v299_v15   ;;  %298 = vst [vmem:[#allocation5] sm:$0xff] %v1666_v1  ;;  %p1627_p8 = scmp.ne.s32.totalorder %s953_s26, %s1626_s27  ;;  %p1632_p10 = scmp.lt.s32.totalorder %s1626_s27, %s1626_s27 }
  0x20   :  { %994 = vmatprep.subr.bf16.mxu0 %v1594_v10  ;;  %380 = vperm.xlu1 %1580, %v299_v15  }
  0x21   :  { %1431 = vmatpush3.bf16.msra.mxu1 %v1659_v19  ;;  %1178 = vmatprep.mubr.msk.f32.mxu1 %vm1665_vm2, %v1666_v1  ;;  %p1633_p11 = por %p1632_p10, %p1631_p9 }
  0x22   :  { %1432 = vmatprep.subr.bf16.mxu1 %v1658_v17 }
  0x23   :  { %995 = vmatpush3.bf16.msra.mxu0 %v1595_v11  ;;  %1584 = vset.pattern.permute.xlu0 %v1660_v20  ;;  %p1634_p12 = pnand %p1633_p11, %p1627_p8 }
  0x24   :  { %996 = vmatprep.subr.bf16.mxu0 %v1596_v12  ;;  %704 = vperm.xlu0 %1584, %v299_v15  }
  0x25   :  { %1582 = vset.pattern.permute.xlu1 %v1661_v24  ;;  %1433 = vmatpush3.bf16.msra.mxu1 %v1659_v19 }
  0x26   :  { %542 = vperm.xlu1 %1582, %v299_v15   ;;  %1434 = vmatprep.subr.bf16.mxu1 %v1658_v17 }
  0x27   :  { %997 = vmatpush3.bf16.msra.mxu0 %v1597_v13 }
  0x28   :  { %998 = vmatprep.subr.bf16.mxu0 %v1598_v14  ;;  %1587 = vset.pattern.permute.xlu0 %v1662_v25 }
  0x29   :  { %1435 = vmatpush3.bf16.msra.mxu1 %v1659_v19 }
  0x2a   :  { %1583 = vset.pattern.permute.xlu1 %v1663_v26  ;;  %1436 = vmatprep.subr.bf16.mxu1 %v1658_v17 }
  0x2b   :  { %999 = vmatpush3.bf16.msra.mxu0 %v1599_v16  ;;  %623 = vperm.xlu1 %1583, %v299_v15  }
  0x2c   :  { %1000 = vmatprep.subr.bf16.mxu0 %v1600_v18 }
  0x2d   :  { %1437 = vmatpush3.bf16.msra.mxu1 %v1659_v19 }
  0x2e   :  { %1438 = vmatprep.subr.bf16.mxu1 %v1658_v17 }
  0x2f   :  { %1001 = vmatpush3.bf16.msra.mxu0 %v1601_v21  ;;  %1585 = vset.pattern.permute.xlu1 %v1664_v27 }
  0x30   :  { %1002 = vmatprep.subr.bf16.mxu0 %v1602_v22  ;;  %785 = vperm.xlu1 %1585, %v299_v15  }
  0x31   :  { %1439 = vmatpush3.bf16.msra.mxu1 %v1659_v19 }
  0x32   :  { %1440 = vmatprep.subr.bf16.mxu1 %v1658_v17 }
  0x33   :  { %1003 = vmatpush3.bf16.msra.mxu0 %v1603_v23 }
  0x34   :  { %1442 = vmatprep.subr.bf16.mxu0 %v1658_v17  ;;  %1586 = vset.pattern.permute.xlu1 %v1662_v25 }
  0x35   :  { %866 = vperm.xlu1 %1586, %v299_v15   ;;  %1441 = vmatpush3.bf16.msra.mxu1 %v1659_v19 }
  0x36   :  { %1458 = vmatprep.subr.bf16.mxu1 %v1658_v17 }
  0x94   :  { %v45_v38 = vpop.permute.xlu0 %44  ;;  %v98_v47 = vpop.permute.xlu1 %97 }
  0x95   :  { %v58_v43 = vmul.f32 %v51_v34, %v45_v38  ;;  %v59_v44 = vmul.f32 %v55_v35, %v45_v38  ;;  %v111_v49 = vmul.f32 %v104_v41, %v98_v47  ;;  %v112_v50 = vmul.f32 %v108_v42, %v98_v47 }
  0x97   :  { %v71_v51 = vadd.f32 %v64_v39, %v58_v43  ;;  %v72_v52 = vadd.f32 %v68_v40, %v59_v44 }
  0x99   :  { %v77_v48 = vpop.permute.xlu0 %76  ;;  %v304_v2 = vpop.permute.xlu1 %303 }
  0x9a   :  { %v90_v53 = vmul.f32 %v83_v45, %v77_v48  ;;  %v91_v54 = vmul.f32 %v87_v46, %v77_v48  ;;  %vm305_vm4 = vcmp.eq.s32.totalorder %v304_v2, %v1781_v5 }
  0x9c   :  { %v92_v55 = vadd.f32 %v90_v53, %v71_v51  ;;  %v93_v56 = vadd.f32 %v91_v54, %v72_v52 }
  0x9e   :  { %v113_v57 = vadd.f32 %v111_v49, %v92_v55  ;;  %v114_v58 = vadd.f32 %v112_v50, %v93_v56  ;;  %v462_v13 = vpop.permute.xlu0 %461 }
  0x9f   :  { %v381_v4 = vpop.permute.xlu1 %380  ;;  %vm463_vm6 = vcmp.eq.s32.totalorder %v462_v13, %v1781_v5 }
  0xa0   :  { %v117_v59 = vmul.f32 0.01, %v113_v57  ;;  %vm116_vm0 = vcmp.ge.f32.partialorder %v114_v58, 0.0  ;;  %v118_v60 = vmul.f32 0.01, %v114_v58  ;;  %vm115_vm1 = vcmp.ge.f32.partialorder %v113_v57, 0.0 }
  0xa1   :  { %vm382_vm3 = vcmp.eq.s32.totalorder %v381_v4, %v1781_v5 }
  0xa2   :  { %v120_v61 = vsel %vm116_vm0, %v114_v58, %v118_v60  ;;  %v119_v62 = vsel %vm115_vm1, %v113_v57, %v117_v59  ;;  %vm782_vm0 = vcmask 48168   ;;  %vm863_vm1 = vcmask 56368  }
  0xa3   :  { %v122_v63 = vpack.c.bf16 %v120_v61, %v120_v61  ;;  %v121_v0 = vpack.c.bf16 %v119_v62, %v119_v62  ;;  %v705_v15 = vpop.permute.xlu0 %704 }
  0xa4   :  { %vm706_vm8 = vcmp.eq.s32.totalorder %v705_v15, %v1781_v5 }
  0xa5   :  { %290 = vmatprep.mubr.bf16.mxu0 %v122_v63  ;;  %v543_v12 = vpop.permute.xlu1 %542 }
  0xa6   :  { %291 = vmatmul.mubr.bf16.vlgmr.msra.gmra.mrb[0].mxu0 %v121_v0  ;;  %vm544_vm5 = vcmp.eq.s32.totalorder %v543_v12, %v1781_v5 }
  0xa7   :  { %1443 = vmatpush3.bf16.msra.mxu0 %v1659_v19  ;;  %1213 = vmatprep.mubr.msk.f32.mxu0 %vm1665_vm2, %v1666_v1 }
  0xa8   :  { %1444 = vmatprep.subr.bf16.mxu0 %v1658_v17 }
  0xaa   :  { %v624_v14 = vpop.permute.xlu1 %623 }
  0xab   :  { %1445 = vmatpush3.bf16.msra.mxu0 %v1659_v19  ;;  %vm625_vm7 = vcmp.eq.s32.totalorder %v624_v14, %v1781_v5 }
  0xac   :  { %1446 = vmatprep.subr.bf16.mxu0 %v1658_v17 }
  0xaf   :  { %1447 = vmatpush3.bf16.msra.mxu0 %v1659_v19  ;;  %v786_v16 = vpop.permute.xlu1 %785 }
  0xb0   :  { %1448 = vmatprep.subr.bf16.mxu0 %v1658_v17  ;;  %vm787_vm10 = vcmp.eq.s32.totalorder %v786_v16, %v1781_v5 }
  0xb3   :  { %1449 = vmatpush3.bf16.msra.mxu0 %v1659_v19 }
  0xb4   :  { %1450 = vmatprep.subr.bf16.mxu0 %v1658_v17  ;;  %v867_v18 = vpop.permute.xlu1 %866 }
  0xb5   :  { %vm868_vm9 = vcmp.eq.s32.totalorder %v867_v18, %v1781_v5 }
  0xb7   :  { %1451 = vmatpush3.bf16.msra.mxu0 %v1659_v19 }
  0xb8   :  { %1452 = vmatprep.subr.bf16.mxu0 %v1658_v17 }
  0xbb   :  { %1453 = vmatpush3.bf16.msra.mxu0 %v1659_v19 }
  0xbc   :  { %1454 = vmatprep.subr.bf16.mxu0 %v1658_v17 }
  0xbf   :  { %1455 = vmatpush3.bf16.msra.mxu0 %v1659_v19 }
  0xc0   :  { %1456 = vmatprep.subr.bf16.mxu0 %v1658_v17 }
  0xc3   :  { %1457 = vmatpush3.bf16.msra.mxu0 %v1659_v19 }
  0xc4   :  { %1474 = vmatprep.subr.bf16.mxu0 %v1658_v17 }
 0x179   :  { %v1004_v3 = vpop.f32.mrb[0].mxu0 }
 0x17a   :  { %v1005_v7 = vpop.f32.mrb[1].mxu0 }
 0x17b   :  { %v1006_v8 = vadd.f32 %v1005_v7, %v1004_v3  ;;  %v1007_v9 = vpop.f32.mrb[2].mxu0 }
 0x17c   :  { %v1008_v10 = vpop.f32.mrb[3].mxu0 }
 0x17d   :  { %v1787_v11 = vadd.f32 %v1006_v8, %v963_v6 }
 0x17f   :  { %1179 = vmatmul.mubr.msk.f32.vlgmr.msra.gmra.mrb[0].mxu1 %vm305_vm4, %v1787_v11  ;;  %1214 = vmatmul.mubr.msk.f32.vlgmr.msra.gmra.mrb[4].mxu0 %vm382_vm3, %v1787_v11 }
 0x180   :  { %1459 = vmatpush3.bf16.msra.mxu1 %v1659_v19  ;;  %1475 = vmatpush3.bf16.msra.mxu0 %v1659_v19 }
 0x181   :  { %1460 = vmatprep.subr.bf16.mxu1 %v1658_v17  ;;  %1476 = vmatprep.subr.bf16.mxu0 %v1658_v17 }
 0x182   :  { %1248 = vmatprep.mubr.msk.f32.mxu1 %vm1665_vm2, %v1666_v1  ;;  %1283 = vmatprep.mubr.msk.f32.mxu0 %vm1665_vm2, %v1666_v1 }
 0x184   :  { %1461 = vmatpush3.bf16.msra.mxu1 %v1659_v19  ;;  %1477 = vmatpush3.bf16.msra.mxu0 %v1659_v19 }
 0x185   :  { %1462 = vmatprep.subr.bf16.mxu1 %v1658_v17  ;;  %1478 = vmatprep.subr.bf16.mxu0 %v1658_v17 }
 0x188   :  { %1463 = vmatpush3.bf16.msra.mxu1 %v1659_v19  ;;  %1479 = vmatpush3.bf16.msra.mxu0 %v1659_v19 }
 0x189   :  { %1464 = vmatprep.subr.bf16.mxu1 %v1658_v17  ;;  %1480 = vmatprep.subr.bf16.mxu0 %v1658_v17 }
 0x18c   :  { %1465 = vmatpush3.bf16.msra.mxu1 %v1659_v19  ;;  %1481 = vmatpush3.bf16.msra.mxu0 %v1659_v19 }
 0x18d   :  { %1466 = vmatprep.subr.bf16.mxu1 %v1658_v17  ;;  %1482 = vmatprep.subr.bf16.mxu0 %v1658_v17 }
 0x190   :  { %1467 = vmatpush3.bf16.msra.mxu1 %v1659_v19  ;;  %1483 = vmatpush3.bf16.msra.mxu0 %v1659_v19 }
 0x191   :  { %1468 = vmatprep.subr.bf16.mxu1 %v1658_v17  ;;  %1484 = vmatprep.subr.bf16.mxu0 %v1658_v17 }
 0x194   :  { %1469 = vmatpush3.bf16.msra.mxu1 %v1659_v19  ;;  %1485 = vmatpush3.bf16.msra.mxu0 %v1659_v19 }
 0x195   :  { %1470 = vmatprep.subr.bf16.mxu1 %v1658_v17  ;;  %1486 = vmatprep.subr.bf16.mxu0 %v1658_v17 }
 0x198   :  { %1471 = vmatpush3.bf16.msra.mxu1 %v1659_v19  ;;  %1487 = vmatpush3.bf16.msra.mxu0 %v1659_v19 }
 0x199   :  { %1472 = vmatprep.subr.bf16.mxu1 %v1658_v17  ;;  %1488 = vmatprep.subr.bf16.mxu0 %v1658_v17 }
 0x19c   :  { %1473 = vmatpush3.bf16.msra.mxu1 %v1659_v19  ;;  %1489 = vmatpush3.bf16.msra.mxu0 %v1659_v19 }
 0x19d   :  { %1490 = vmatprep.subr.bf16.mxu1 %v1658_v17  ;;  %1506 = vmatprep.subr.bf16.mxu0 %v1658_v17 }
 0x19f   :  { %1249 = vmatmul.mubr.msk.f32.vlgmr.msra.gmra.mrb[2].mxu1 %vm463_vm6, %v1787_v11  ;;  %1284 = vmatmul.mubr.msk.f32.vlgmr.msra.gmra.mrb[6].mxu0 %vm544_vm5, %v1787_v11 }
 0x1a0   :  { %1491 = vmatpush3.bf16.msra.mxu1 %v1659_v19  ;;  %1507 = vmatpush3.bf16.msra.mxu0 %v1659_v19 }
 0x1a1   :  { %1492 = vmatprep.subr.bf16.mxu1 %v1658_v17  ;;  %1508 = vmatprep.subr.bf16.mxu0 %v1658_v17 }
 0x1a2   :  { %1318 = vmatprep.mubr.msk.f32.mxu1 %vm1665_vm2, %v1666_v1  ;;  %1353 = vmatprep.mubr.msk.f32.mxu0 %vm1665_vm2, %v1666_v1 }
 0x1a4   :  { %1493 = vmatpush3.bf16.msra.mxu1 %v1659_v19  ;;  %1509 = vmatpush3.bf16.msra.mxu0 %v1659_v19 }
 0x1a5   :  { %1494 = vmatprep.subr.bf16.mxu1 %v1658_v17  ;;  %1510 = vmatprep.subr.bf16.mxu0 %v1658_v17 }
 0x1a8   :  { %1495 = vmatpush3.bf16.msra.mxu1 %v1659_v19  ;;  %1511 = vmatpush3.bf16.msra.mxu0 %v1659_v19 }
 0x1a9   :  { %1496 = vmatprep.subr.bf16.mxu1 %v1658_v17  ;;  %1512 = vmatprep.subr.bf16.mxu0 %v1658_v17 }
 0x1ac   :  { %1497 = vmatpush3.bf16.msra.mxu1 %v1659_v19  ;;  %1513 = vmatpush3.bf16.msra.mxu0 %v1659_v19 }
 0x1ad   :  { %1498 = vmatprep.subr.bf16.mxu1 %v1658_v17  ;;  %1514 = vmatprep.subr.bf16.mxu0 %v1658_v17 }
 0x1b0   :  { %1499 = vmatpush3.bf16.msra.mxu1 %v1659_v19  ;;  %1515 = vmatpush3.bf16.msra.mxu0 %v1659_v19 }
 0x1b1   :  { %1500 = vmatprep.subr.bf16.mxu1 %v1658_v17  ;;  %1516 = vmatprep.subr.bf16.mxu0 %v1658_v17 }
 0x1b4   :  { %1501 = vmatpush3.bf16.msra.mxu1 %v1659_v19  ;;  %1517 = vmatpush3.bf16.msra.mxu0 %v1659_v19 }
 0x1b5   :  { %1502 = vmatprep.subr.bf16.mxu1 %v1658_v17  ;;  %1518 = vmatprep.subr.bf16.mxu0 %v1658_v17 }
 0x1b8   :  { %1503 = vmatpush3.bf16.msra.mxu1 %v1659_v19  ;;  %1519 = vmatpush3.bf16.msra.mxu0 %v1659_v19 }
 0x1b9   :  { %1504 = vmatprep.subr.bf16.mxu1 %v1658_v17  ;;  %1520 = vmatprep.subr.bf16.mxu0 %v1658_v17 }
 0x1bc   :  { %1505 = vmatpush3.bf16.msra.mxu1 %v1659_v19  ;;  %1521 = vmatpush3.bf16.msra.mxu0 %v1659_v19 }
 0x1bd   :  { %1522 = vmatprep.subr.bf16.mxu1 %v1658_v17  ;;  %1538 = vmatprep.subr.bf16.mxu0 %v1658_v17 }
 0x1bf   :  { %1319 = vmatmul.mubr.msk.f32.vlgmr.msra.gmra.mrb[4].mxu1 %vm625_vm7, %v1787_v11  ;;  %1354 = vmatmul.mubr.msk.f32.vlgmr.msra.gmra.mrb[8].mxu0 %vm706_vm8, %v1787_v11 }
 0x1c0   :  { %1523 = vmatpush3.bf16.msra.mxu1 %v1659_v19  ;;  %1539 = vmatpush3.bf16.msra.mxu0 %v1659_v19 }
 0x1c1   :  { %1524 = vmatprep.subr.bf16.mxu1 %v1658_v17  ;;  %1540 = vmatprep.subr.bf16.mxu0 %v1658_v17 }
 0x1c2   :  { %1388 = vmatprep.mubr.msk.f32.mxu1 %vm1665_vm2, %v1666_v1  ;;  %1423 = vmatprep.mubr.msk.f32.mxu0 %vm1665_vm2, %v1666_v1  ;;  %vm944_vm2 = vcmask 64568  }
 0x1c4   :  { %1525 = vmatpush3.bf16.msra.mxu1 %v1659_v19  ;;  %1541 = vmatpush3.bf16.msra.mxu0 %v1659_v19 }
 0x1c5   :  { %1526 = vmatprep.subr.bf16.mxu1 %v1658_v17  ;;  %1542 = vmatprep.subr.bf16.mxu0 %v1658_v17 }
 0x1c8   :  { %1527 = vmatpush3.bf16.msra.mxu1 %v1659_v19  ;;  %1543 = vmatpush3.bf16.msra.mxu0 %v1659_v19 }
 0x1c9   :  { %1528 = vmatprep.subr.bf16.mxu1 %v1658_v17  ;;  %1544 = vmatprep.subr.bf16.mxu0 %v1658_v17 }
 0x1cc   :  { %1529 = vmatpush3.bf16.msra.mxu1 %v1659_v19  ;;  %1545 = vmatpush3.bf16.msra.mxu0 %v1659_v19 }
 0x1cd   :  { %1530 = vmatprep.subr.bf16.mxu1 %v1658_v17  ;;  %1546 = vmatprep.subr.bf16.mxu0 %v1658_v17 }
 0x1d0   :  { %1531 = vmatpush3.bf16.msra.mxu1 %v1659_v19  ;;  %1547 = vmatpush3.bf16.msra.mxu0 %v1659_v19 }
 0x1d1   :  { %1532 = vmatprep.subr.bf16.mxu1 %v1658_v17  ;;  %1548 = vmatprep.subr.bf16.mxu0 %v1658_v17 }
 0x1d4   :  { %1533 = vmatpush3.bf16.msra.mxu1 %v1659_v19  ;;  %1549 = vmatpush3.bf16.msra.mxu0 %v1659_v19 }
 0x1d5   :  { %1534 = vmatprep.subr.bf16.mxu1 %v1658_v17  ;;  %1550 = vmatprep.subr.bf16.mxu0 %v1658_v17 }
 0x1d8   :  { %1535 = vmatpush3.bf16.msra.mxu1 %v1659_v19  ;;  %1551 = vmatpush3.bf16.msra.mxu0 %v1659_v19 }
 0x1d9   :  { %1536 = vmatprep.subr.bf16.mxu1 %v1658_v17  ;;  %1552 = vmatprep.subr.bf16.mxu0 %v1658_v17 }
 0x1dc   :  { %1537 = vmatpush3.bf16.msra.mxu1 %v1659_v19  ;;  %1553 = vmatpush3.bf16.msra.mxu0 %v1659_v19 }
 0x1df   :  { %1389 = vmatmul.mubr.msk.f32.vlgmr.msra.gmra.mrb[6].mxu1 %vm787_vm10, %v1787_v11  ;;  %1424 = vmatmul.mubr.msk.f32.vlgmr.msra.gmra.mrb[10].mxu0 %vm868_vm9, %v1787_v11 }
 0x252   :  { %v373_v20 = vpop.f32.mrb[0].mxu1  ;;  %v450_v21 = vpop.f32.mrb[4].mxu0 }
 0x253   :  { %378 = vst.msk [vmem:[#allocation5] sm:$0xff] %vm377_vm11, %v373_v20  ;;  %455 = vrot.lane.b32.xlu0 %v450_v21, %s1667_s5  ;;  %v1180_v17 = vpop.f32.mrb[1].mxu1  ;;  %v1215_v22 = vpop.f32.mrb[5].mxu0 }
 0x272   :  { %v531_v23 = vpop.f32.mrb[2].mxu1  ;;  %v612_v24 = vpop.f32.mrb[6].mxu0 }
 0x273   :  { %617 = vrot.lane.b32.xlu0 %v612_v24, %s1668_s20  ;;  %v1285_v19 = vpop.f32.mrb[7].mxu0  ;;  %536 = vrot.lane.b32.xlu1 %v531_v23, %s1669_s21  ;;  %v1250_v25 = vpop.f32.mrb[3].mxu1 }
 0x292   :  { %v693_v26 = vpop.f32.mrb[4].mxu1  ;;  %v774_v27 = vpop.f32.mrb[8].mxu0 }
 0x293   :  { %698 = vrot.lane.b32.xlu1 %v693_v26, %s1654_s8  ;;  %v1320_v28 = vpop.f32.mrb[5].mxu1  ;;  %779 = vrot.lane.b32.xlu0 %v774_v27, %s1670_s22  ;;  %v1355_v29 = vpop.f32.mrb[9].mxu0 }
 0x2b2   :  { %v855_v30 = vpop.f32.mrb[6].mxu1  ;;  %v936_v31 = vpop.f32.mrb[10].mxu0 }
 0x2b3   :  { %860 = vrot.lane.b32.xlu1 %v855_v30, %s1671_s23  ;;  %v1390_v32 = vpop.f32.mrb[7].mxu1  ;;  %941 = vrot.lane.b32.xlu0 %v936_v31, %s1672_s24  ;;  %v1425_v33 = vpop.f32.mrb[11].mxu0 }
 0x2c5   :  { %v456_v34 = vpop.permute.xlu0 %455 }
 0x2c6   :  { %459 = vst.msk [vmem:[#allocation5] sm:$0xff] %vm458_vm12, %v456_v34 }
 0x2e5   :  { %v537_v35 = vpop.permute.xlu1 %536  ;;  %v618_v36 = vpop.permute.xlu0 %617 }
 0x2e6   :  { %540 = vst.msk [vmem:[#allocation5] sm:$0xff] %vm539_vm13, %v537_v35 }
 0x2e7   :  { %621 = vst.msk [vmem:[#allocation5] sm:$0xff] %vm620_vm14, %v618_v36 }
 0x305   :  { %v699_v37 = vpop.permute.xlu1 %698  ;;  %v780_v38 = vpop.permute.xlu0 %779 }
 0x306   :  { %702 = vst.msk [vmem:[#allocation5] sm:$0xff] %vm701_vm15, %v699_v37 }
 0x307   :  { %783 = vst.msk [vmem:[#allocation5] sm:$0xff] %vm782_vm0, %v780_v38 }
 0x325   :  { %v861_v39 = vpop.permute.xlu1 %860  ;;  %v942_v40 = vpop.permute.xlu0 %941 }
 0x326   :  { %864 = vst.msk [vmem:[#allocation5] sm:$0xff] %vm863_vm1, %v861_v39 }
 0x327   :  { %945 = vst.msk [vmem:[#allocation5] sm:$0xff] %vm944_vm2, %v942_v40 }
 0x328   :  { %1637 = shalt.err (!%p1634_p12)
}
 0x329   :  { %s1638_s30 = scalar_lea.hbm %s1929_s6, 128 }
 0x32a   :  { %p1639_p13 = scmp.ne.s32.totalorder %s1929_s6, %s1638_s30  ;;  %p1642_p0 = scmp.lt.u32.totalorder %s1638_s30, %s1929_s6 }
 0x32c   :  { %p1644_p1 = pnand %p1642_p0, %p1639_p13 }
 0x32e   :  { %1647 = shalt.err (!%p1644_p1)
}
 0x32f   :  { %955 = dma.vmem_to_hbm [thread:$0]  %s953_s26, 128, %s1929_s6, [#allocation4]  }
 0x330   :  { %1650 = dma.done.wait [#allocation4], 128  }
 0x331   :  { %1651 = vsyncadd [#allocation4], 4294967168 }
 0x332   :  { %959 = vsyncpa [#allocation3], 1 }
 0x333   :  { %960 = vsyncpa [#allocation4], 1 }

</bundles_post_ra>
